<compile_context>
chip_gen: v6e
topology: v6e:2x2x1
jax: 0.10.0
libtpu: 0.0.40
codegen_flags: <defaults>
</compile_context>

<pallas_src>
import math

import jax
import jax.numpy as jnp
from jax.experimental import pallas as pl
from jax.experimental.pallas import tpu as pltpu

HIDDEN = 256
NEG_SLOPE = 0.01   # F.leaky_relu default negative_slope
N_PAD = 128        # pad n_actions up to one full lane width (unmasked vst)
WSLAB_COLS = 3 * HIDDEN + N_PAD   # [w2 | w3 | w4 | w5_padded]


def _leaky_relu(v):
    return jnp.where(v > 0, v, NEG_SLOPE * v)


def _activation_dtype():
    """bf16 elementwise math on chips with a bf16 VPU (v6e/v7x); f32 on v5e-."""
    try:
        kind = jax.devices()[0].device_kind.lower()
    except Exception:
        return jnp.float32
    if any(tag in kind for tag in ("v2", "v3", "v4", "v5")):
        return jnp.float32
    return jnp.bfloat16


def _choose_tile_m(B):
    """Batch-tile size: big tiles to amortize per-step overhead, >=2 tiles when
    B is large (v7x megacore), minimal padding waste (v5e is MXU-bound)."""
    if B <= 256:
        return max(8, -(-B // 8) * 8)          # latency path: one aligned tile
    candidates = (1024, 512, 256, 128)
    # Largest tile with <=12.5% padding waste that still yields >=2 tiles.
    for tm in candidates:
        b_pad = -(-B // tm) * tm
        if b_pad // tm >= 2 and (b_pad - B) <= b_pad // 8:
            return tm
    # Fallback: minimize padding (prefer the larger tile on ties).
    return min(candidates, key=lambda tm: (-(-B // tm) * tm - B, -tm))


def _make_dqn_kernel(act_dtype):
    def dqn_kernel(x_ref, w1_ref, ws_ref, bs_ref, o_ref):
        bs = bs_ref[...].astype(act_dtype)                 # (8, HIDDEN)
        x = x_ref[...].astype(jnp.bfloat16)

        h = jnp.dot(x, w1_ref[...], preferred_element_type=jnp.float32)
        h = _leaky_relu(h.astype(act_dtype) + bs[0:1, :])

        for i in range(3):                                 # layers 2..4, static unroll
            w = ws_ref[:, i * HIDDEN:(i + 1) * HIDDEN]     # 128-aligned static view
            h = jnp.dot(h.astype(jnp.bfloat16), w, preferred_element_type=jnp.float32)
            h = _leaky_relu(h.astype(act_dtype) + bs[i + 1:i + 2, :])

        w5 = ws_ref[:, 3 * HIDDEN:3 * HIDDEN + N_PAD]
        out = jnp.dot(h.astype(jnp.bfloat16), w5, preferred_element_type=jnp.float32)
        out = out + bs[4:5, 0:N_PAD]
        o_ref[...] = out.astype(o_ref.dtype)               # bf16, lane-dense store

    return dqn_kernel


def init_dqn_params(key, n_observations, n_actions):
    """PyTorch nn.Linear-style init (U[-1/sqrt(fan_in), +]), packed for the kernel."""
    dims = [(n_observations, HIDDEN), (HIDDEN, HIDDEN), (HIDDEN, HIDDEN),
            (HIDDEN, HIDDEN), (HIDDEN, n_actions)]
    ws, bs = [], []
    for fan_in, fan_out in dims:
        key, kw, kb = jax.random.split(key, 3)
        bound = 1.0 / math.sqrt(fan_in)
        ws.append(jax.random.uniform(kw, (fan_in, fan_out), jnp.float32, -bound, bound))
        bs.append(jax.random.uniform(kb, (fan_out,), jnp.float32, -bound, bound))

    w1 = ws[0].astype(jnp.bfloat16)                                    # (n_obs, H)
    w5_pad = jnp.zeros((HIDDEN, N_PAD), jnp.float32).at[:, :n_actions].set(ws[4])
    wslab = jnp.concatenate([ws[1], ws[2], ws[3], w5_pad],
                            axis=1).astype(jnp.bfloat16)               # (H, 3H+128)
    bslab = jnp.zeros((8, HIDDEN), jnp.float32)                        # rows 5..7 pad
    for i in range(4):
        bslab = bslab.at[i, :].set(bs[i])
    bslab = bslab.at[4, :n_actions].set(bs[4])
    return dict(w1=w1, wslab=wslab, bslab=bslab, n_actions=n_actions)


def dqn_forward(x, p):
    B, n_obs = x.shape
    n_actions = p["n_actions"]
    act_dtype = _activation_dtype()

    tile_m = _choose_tile_m(B)
    b_pad = -(-B // tile_m) * tile_m
    if b_pad != B:
        x = jnp.pad(x, ((0, b_pad - B), (0, 0)))
    grid = (b_pad // tile_m,)

    w1, wslab, bslab = p["w1"], p["wslab"], p["bslab"]

    flops = 2 * b_pad * (n_obs * HIDDEN + 3 * HIDDEN * HIDDEN + HIDDEN * N_PAD)
    bytes_accessed = (x.size * x.dtype.itemsize
                      + w1.size * w1.dtype.itemsize
                      + wslab.size * wslab.dtype.itemsize
                      + bslab.size * bslab.dtype.itemsize
                      + b_pad * N_PAD * 2)                 # bf16 output

    out = pl.pallas_call(
        _make_dqn_kernel(act_dtype),
        out_shape=jax.ShapeDtypeStruct((b_pad, N_PAD), jnp.bfloat16),
        grid=grid,
        in_specs=[
            pl.BlockSpec((tile_m, n_obs), lambda i: (i, 0)),           # x: batch-tiled
            pl.BlockSpec((n_obs, HIDDEN), lambda i: (0, 0)),           # w1: resident
            pl.BlockSpec((HIDDEN, WSLAB_COLS), lambda i: (0, 0)),      # w2..w5 slab
            pl.BlockSpec((8, HIDDEN), lambda i: (0, 0)),               # bias slab
        ],
        out_specs=pl.BlockSpec((tile_m, N_PAD), lambda i: (i, 0)),
        compiler_params=pltpu.CompilerParams(
            dimension_semantics=("parallel",)),
        cost_estimate=pl.CostEstimate(
            flops=flops, transcendentals=0, bytes_accessed=bytes_accessed),
    )(x, w1, wslab, bslab)

    return out[:B, :n_actions].astype(jnp.float32)


def dqn_reference(x, p, act_dtype):
    """Pure-JAX reference mirroring the kernel's rounding points."""
    ws = p["wslab"].astype(jnp.float32)
    bsa = p["bslab"].astype(act_dtype)

    def bf(a):
        return a.astype(jnp.bfloat16).astype(jnp.float32)

    h = jnp.dot(bf(x), p["w1"].astype(jnp.float32)).astype(act_dtype)
    h = _leaky_relu(h + bsa[0])
    for i in range(3):
        w = ws[:, i * HIDDEN:(i + 1) * HIDDEN]
        h = jnp.dot(bf(h), w).astype(act_dtype)
        h = _leaky_relu(h + bsa[i + 1])
    w5 = ws[:, 3 * HIDDEN:3 * HIDDEN + N_PAD]
    out = jnp.dot(bf(h), w5) + bsa[4, :N_PAD].astype(jnp.float32)
    out = out.astype(jnp.bfloat16).astype(jnp.float32)     # kernel stores bf16
    return out[:, :p["n_actions"]]


if __name__ == "__main__":
    # CartPole-like shapes: 4 observations, 2 actions, small batch.
    n_observations, n_actions, batch = 4, 2, 8

    key = jax.random.PRNGKey(0)
    key, kx = jax.random.split(key)
    x = jax.random.normal(kx, (batch, n_observations), jnp.float32)
    params = init_dqn_params(key, n_observations, n_actions)

    out = jax.block_until_ready(dqn_forward(x, params))
    ref = dqn_reference(x, params, _activation_dtype())

    assert out.shape == (batch, n_actions)
    assert jnp.allclose(out, ref, atol=1e-2, rtol=1e-2), "mismatch vs reference"

    print("KERNEL_OK")
</pallas_src>

<mosaic_0001>
module attributes {stable_mosaic.version = 11 : i64} {
  func.func @dqn_kernel(%arg0: i32, %arg1: memref<8x4xf32, #tpu.memory_space<vmem>>, %arg2: memref<4x256xbf16, #tpu.memory_space<vmem>>, %arg3: memref<256x896xbf16, #tpu.memory_space<vmem>>, %arg4: memref<8x256xf32, #tpu.memory_space<vmem>>, %arg5: memref<8x128xbf16, #tpu.memory_space<vmem>>) attributes {dimension_semantics = [#tpu.dimension_semantics<parallel>], iteration_bounds = array<i64: 1>, scalar_prefetch = 0 : i64, scratch_operands = 0 : i64, tpu.core_type = #tpu.core_type<tc>, window_params = [{transform_indices = @transform_0, window_bounds = array<i64: 8, 4>}, {pipeline_mode = #tpu.pipeline_mode<synchronous>, transform_indices = @transform_1, window_bounds = array<i64: 4, 256>}, {pipeline_mode = #tpu.pipeline_mode<synchronous>, transform_indices = @transform_2, window_bounds = array<i64: 256, 896>}, {pipeline_mode = #tpu.pipeline_mode<synchronous>, transform_indices = @transform_3, window_bounds = array<i64: 8, 256>}, {transform_indices = @transform_4, window_bounds = array<i64: 8, 128>}]} {
    %c0 = arith.constant 0 : index
    %c0_0 = arith.constant 0 : index
    %0 = vector.load %arg4[%c0, %c0_0] : memref<8x256xf32, #tpu.memory_space<vmem>>, vector<8x256xf32>
    %1 = arith.truncf %0 : vector<8x256xf32> to vector<8x256xbf16>
    %c0_1 = arith.constant 0 : index
    %c0_2 = arith.constant 0 : index
    %2 = vector.load %arg1[%c0_1, %c0_2] : memref<8x4xf32, #tpu.memory_space<vmem>>, vector<8x4xf32>
    %3 = arith.truncf %2 : vector<8x4xf32> to vector<8x4xbf16>
    %c0_3 = arith.constant 0 : index
    %c0_4 = arith.constant 0 : index
    %4 = vector.load %arg2[%c0_3, %c0_4] : memref<4x256xbf16, #tpu.memory_space<vmem>>, vector<4x256xbf16>
    %cst = arith.constant dense<0.000000e+00> : vector<8x256xf32>
    %5 = tpu.matmul %3, %4, %cst {dimension_numbers = #tpu.dot_dimension_numbers<[1], [0], [0], [1], [0, 0, 1, 1], [], []>} : vector<8x4xbf16>, vector<4x256xbf16>, vector<8x256xf32> -> vector<8x256xf32>
    %6 = arith.truncf %5 : vector<8x256xf32> to vector<8x256xbf16>
    %7 = vector.extract_strided_slice %1 {offsets = [0, 0], sizes = [1, 256], strides = [1, 1]} : vector<8x256xbf16> to vector<1x256xbf16>
    %8 = vector.broadcast %7 : vector<1x256xbf16> to vector<8x256xbf16>
    %9 = arith.addf %6, %8 : vector<8x256xbf16>
    %cst_5 = arith.constant 0.000000e+00 : bf16
    %10 = vector.broadcast %cst_5 : bf16 to vector<8x256xbf16>
    %11 = arith.cmpf ogt, %9, %10 : vector<8x256xbf16>
    %cst_6 = arith.constant 1.000980e-02 : bf16
    %12 = vector.broadcast %cst_6 : bf16 to vector<8x256xbf16>
    %13 = arith.mulf %12, %9 : vector<8x256xbf16>
    %14 = arith.select %11, %9, %13 : vector<8x256xi1>, vector<8x256xbf16>
    %c0_7 = arith.constant 0 : index
    %c0_8 = arith.constant 0 : index
    %15 = vector.load %arg3[%c0_7, %c0_8] : memref<256x896xbf16, #tpu.memory_space<vmem>>, vector<256x256xbf16>
    %cst_9 = arith.constant dense<0.000000e+00> : vector<8x256xf32>
    %16 = tpu.matmul %14, %15, %cst_9 {dimension_numbers = #tpu.dot_dimension_numbers<[1], [0], [0], [1], [0, 0, 1, 1], [], []>} : vector<8x256xbf16>, vector<256x256xbf16>, vector<8x256xf32> -> vector<8x256xf32>
    %17 = arith.truncf %16 : vector<8x256xf32> to vector<8x256xbf16>
    %18 = vector.extract_strided_slice %1 {offsets = [1, 0], sizes = [1, 256], strides = [1, 1]} : vector<8x256xbf16> to vector<1x256xbf16>
    %19 = vector.broadcast %18 : vector<1x256xbf16> to vector<8x256xbf16>
    %20 = arith.addf %17, %19 : vector<8x256xbf16>
    %cst_10 = arith.constant 0.000000e+00 : bf16
    %21 = vector.broadcast %cst_10 : bf16 to vector<8x256xbf16>
    %22 = arith.cmpf ogt, %20, %21 : vector<8x256xbf16>
    %cst_11 = arith.constant 1.000980e-02 : bf16
    %23 = vector.broadcast %cst_11 : bf16 to vector<8x256xbf16>
    %24 = arith.mulf %23, %20 : vector<8x256xbf16>
    %25 = arith.select %22, %20, %24 : vector<8x256xi1>, vector<8x256xbf16>
    %c0_12 = arith.constant 0 : index
    %c256 = arith.constant 256 : index
    %26 = vector.load %arg3[%c0_12, %c256] : memref<256x896xbf16, #tpu.memory_space<vmem>>, vector<256x256xbf16>
    %cst_13 = arith.constant dense<0.000000e+00> : vector<8x256xf32>
    %27 = tpu.matmul %25, %26, %cst_13 {dimension_numbers = #tpu.dot_dimension_numbers<[1], [0], [0], [1], [0, 0, 1, 1], [], []>} : vector<8x256xbf16>, vector<256x256xbf16>, vector<8x256xf32> -> vector<8x256xf32>
    %28 = arith.truncf %27 : vector<8x256xf32> to vector<8x256xbf16>
    %29 = vector.extract_strided_slice %1 {offsets = [2, 0], sizes = [1, 256], strides = [1, 1]} : vector<8x256xbf16> to vector<1x256xbf16>
    %30 = vector.broadcast %29 : vector<1x256xbf16> to vector<8x256xbf16>
    %31 = arith.addf %28, %30 : vector<8x256xbf16>
    %cst_14 = arith.constant 0.000000e+00 : bf16
    %32 = vector.broadcast %cst_14 : bf16 to vector<8x256xbf16>
    %33 = arith.cmpf ogt, %31, %32 : vector<8x256xbf16>
    %cst_15 = arith.constant 1.000980e-02 : bf16
    %34 = vector.broadcast %cst_15 : bf16 to vector<8x256xbf16>
    %35 = arith.mulf %34, %31 : vector<8x256xbf16>
    %36 = arith.select %33, %31, %35 : vector<8x256xi1>, vector<8x256xbf16>
    %c0_16 = arith.constant 0 : index
    %c512 = arith.constant 512 : index
    %37 = vector.load %arg3[%c0_16, %c512] : memref<256x896xbf16, #tpu.memory_space<vmem>>, vector<256x256xbf16>
    %cst_17 = arith.constant dense<0.000000e+00> : vector<8x256xf32>
    %38 = tpu.matmul %36, %37, %cst_17 {dimension_numbers = #tpu.dot_dimension_numbers<[1], [0], [0], [1], [0, 0, 1, 1], [], []>} : vector<8x256xbf16>, vector<256x256xbf16>, vector<8x256xf32> -> vector<8x256xf32>
    %39 = arith.truncf %38 : vector<8x256xf32> to vector<8x256xbf16>
    %40 = vector.extract_strided_slice %1 {offsets = [3, 0], sizes = [1, 256], strides = [1, 1]} : vector<8x256xbf16> to vector<1x256xbf16>
    %41 = vector.broadcast %40 : vector<1x256xbf16> to vector<8x256xbf16>
    %42 = arith.addf %39, %41 : vector<8x256xbf16>
    %cst_18 = arith.constant 0.000000e+00 : bf16
    %43 = vector.broadcast %cst_18 : bf16 to vector<8x256xbf16>
    %44 = arith.cmpf ogt, %42, %43 : vector<8x256xbf16>
    %cst_19 = arith.constant 1.000980e-02 : bf16
    %45 = vector.broadcast %cst_19 : bf16 to vector<8x256xbf16>
    %46 = arith.mulf %45, %42 : vector<8x256xbf16>
    %47 = arith.select %44, %42, %46 : vector<8x256xi1>, vector<8x256xbf16>
    %c0_20 = arith.constant 0 : index
    %c768 = arith.constant 768 : index
    %48 = vector.load %arg3[%c0_20, %c768] : memref<256x896xbf16, #tpu.memory_space<vmem>>, vector<256x128xbf16>
    %cst_21 = arith.constant dense<0.000000e+00> : vector<8x128xf32>
    %49 = tpu.matmul %47, %48, %cst_21 {dimension_numbers = #tpu.dot_dimension_numbers<[1], [0], [0], [1], [0, 0, 1, 1], [], []>} : vector<8x256xbf16>, vector<256x128xbf16>, vector<8x128xf32> -> vector<8x128xf32>
    %50 = vector.extract_strided_slice %1 {offsets = [4, 0], sizes = [1, 128], strides = [1, 1]} : vector<8x256xbf16> to vector<1x128xbf16>
    %51 = arith.extf %50 : vector<1x128xbf16> to vector<1x128xf32>
    %52 = vector.broadcast %51 : vector<1x128xf32> to vector<8x128xf32>
    %53 = arith.addf %49, %52 : vector<8x128xf32>
    %54 = arith.truncf %53 : vector<8x128xf32> to vector<8x128xbf16>
    %c0_22 = arith.constant 0 : index
    %c0_23 = arith.constant 0 : index
    %55 = vector.load %arg5[%c0_22, %c0_23] : memref<8x128xbf16, #tpu.memory_space<vmem>>, vector<8x128xbf16>
    tpu.vector_store %arg5[%c0_22, %c0_23], %54 {strides = array<i32>} : memref<8x128xbf16, #tpu.memory_space<vmem>>, vector<8x128xbf16>,
    return
  }
  func.func @transform_0(%arg0: i32) -> (i32, i32) {
    %c0_i32 = arith.constant 0 : i32
    %c0_i32_0 = arith.constant 0 : i32
    return %arg0, %c0_i32 : i32, i32
  }
  func.func @transform_1(%arg0: i32) -> (i32, i32) {
    %c0_i32 = arith.constant 0 : i32
    %c0_i32_0 = arith.constant 0 : i32
    %c0_i32_1 = arith.constant 0 : i32
    return %c0_i32, %c0_i32_0 : i32, i32
  }
  func.func @transform_2(%arg0: i32) -> (i32, i32) {
    %c0_i32 = arith.constant 0 : i32
    %c0_i32_0 = arith.constant 0 : i32
    %c0_i32_1 = arith.constant 0 : i32
    return %c0_i32, %c0_i32_0 : i32, i32
  }
  func.func @transform_3(%arg0: i32) -> (i32, i32) {
    %c0_i32 = arith.constant 0 : i32
    %c0_i32_0 = arith.constant 0 : i32
    %c0_i32_1 = arith.constant 0 : i32
    return %c0_i32, %c0_i32_0 : i32, i32
  }
  func.func @transform_4(%arg0: i32) -> (i32, i32) {
    %c0_i32 = arith.constant 0 : i32
    %c0_i32_0 = arith.constant 0 : i32
    return %arg0, %c0_i32 : i32, i32
  }
}

</mosaic_0001>

<bundles_post_ra>
// kernel: tpu_custom_call.1
= control target key start
LH: loop header
LB: loop body
LE: loop exit
PB: predicated region body
PF: predicated region fallthrough
CT: control target
= control target key end

     0   :  { %9 = vsyncpa [#allocation3], 0  ;;  %s1544_s0 = inlined_call_operand.vmem [shape: f32[8,4], index: 0, kind: input, shape index: {}]   ;;  %s1545_s1 = inlined_call_operand.hbm [shape: bf16[4,256], index: 1, kind: input, shape index: {}]   ;;  %s1546_s2 = inlined_call_operand.hbm [shape: bf16[256,896], index: 2, kind: input, shape index: {}]   ;;  %s1547_s3 = inlined_call_operand.vmem [shape: f32[8,256], index: 3, kind: input, shape index: {}]   ;;  %s1548_s4 = inlined_call_operand.hbm [shape: bf16[8,128], index: 4, kind: output, shape index: {}]  }
   0x1   :  { %10 = vsyncpa [#allocation6], 0 }
   0x2   :  { %11 = vsyncpa [#allocation4], 0  ;;  %s1457_s15 = smov [#allocation2]   ;;  %s1458_s17 = smov [#allocation5]  }
   0x3   :  { %s20_s16 = sshll.u32 %s1457_s15, 4  ;;  %s29_s18 = sshll.u32 %s1458_s17, 4  ;;  %s21_s16 = int_to_ptr.vmem [resolvable:$true] %s20_s16  ;;  %s30_s18 = int_to_ptr.vmem [resolvable:$true] %s29_s18 }
   0x4   :  { %s1399_s19 = scalar_lea.vmem %s21_s16, 64  ;;  %p1404_p1 = scmp.lt.s32.totalorder %s21_s16, %s21_s16 }
   0x5   :  { %p1400_p0 = scmp.ne.s32.totalorder %s21_s16, %s1399_s19  ;;  %p1405_p2 = scmp.lt.s32.totalorder %s1399_s19, %s1399_s19 }
   0x7   :  { %p1406_p3 = por %p1405_p2, %p1404_p1 }
   0x9   :  { %p1407_p4 = pnand %p1406_p3, %p1400_p0 }
   0xb   :  { %1410 = shalt.err (!%p1407_p4)
}
   0xc   :  { %23 = dma.hbm_to_vmem [thread:$0]  %s1545_s1, 64, %s21_s16, [#allocation3]  }
   0xd   :  { %s1419_s22 = scalar_lea.vmem %s30_s18, 14336  ;;  %p1424_p6 = scmp.lt.s32.totalorder %s30_s18, %s30_s18 }
   0xe   :  { %p1420_p5 = scmp.ne.s32.totalorder %s30_s18, %s1419_s22  ;;  %p1425_p7 = scmp.lt.s32.totalorder %s1419_s22, %s1419_s22 }
  0x10   :  { %p1426_p8 = por %p1425_p7, %p1424_p6 }
  0x12   :  { %p1427_p9 = pnand %p1426_p8, %p1420_p5 }
  0x14   :  { %1430 = shalt.err (!%p1427_p9)
}
  0x15   :  { %s1459_s23 = smov 448   ;;  %s1460_s24 = smov 28  }
  0x16   :  { %35 = dma.hbm_to_vmem [thread:$0]  %s1546_s2, 14336, %s30_s18, [#allocation6], %s1459_s23, %s1459_s23, %s1460_s24  }
  0x17   :  { %1451 = dma.done.wait [#allocation3], 64  }
  0x18   :  { %1452 = vsyncadd [#allocation3], 4294967232 }
  0x19   :  { %1453 = dma.done.wait [#allocation6], 14336  }
  0x1a   :  { %1454 = vsyncadd [#allocation6], 4294952960  ;;  %v1461_v0 = vmov 0   ;;  %vm66_vm0 = vcmask 1041408   ;;  %v50_v2 = vld [vmem:[%s1544_s0] sm:$0xff]  ;;  %vm62_vm1 = vcmask 31744  }
  0x1b   :  { %105 = vmatprep.mubr.bf16.mxu0 %v1461_v0  ;;  %v1088_v1 = vld.sshfl [vmem:[#allocation2] sm:$0x33 pattern:$0x76325410]  ;;  %v1231_v5 = vld [vmem:[#allocation5 + $0x18c] ss:$28 sps:$4 sm:$0xff]   ;;  %v51_v8 = vpack.c.bf16 %v50_v2, %v50_v2  ;;  %v119_v2 = vlaneseq }
  0x1c   :  { %v61_v3 = vcombine.high %v1088_v1, %v1088_v1  ;;  %v68_v4 = vsel %vm66_vm0, %v1088_v1, 0  ;;  %v1233_v6 = vld [vmem:[#allocation5 + $0x188] ss:$28 sps:$4 sm:$0xff]   ;;  %v1234_v7 = vld [vmem:[#allocation5 + $0x154] ss:$28 sps:$4 sm:$0xff]   ;;  %330 = vmatprep.subr.bf16.mxu1 %v1231_v5 }
  0x1d   :  { %331 = vmatpush1.bf16.msra.mxu1 %v1233_v6  ;;  %v1236_v9 = vld [vmem:[#allocation5 + $0x150] ss:$28 sps:$4 sm:$0xff]   ;;  %v1237_v10 = vld [vmem:[#allocation5 + $0x11c] ss:$28 sps:$4 sm:$0xff]   ;;  %v1240_v12 = vld [vmem:[#allocation5 + $0xe4] ss:$28 sps:$4 sm:$0xff]  }
  0x1e   :  { %1089 = vmatprep.subr.msk.bf16.mxu0 %vm66_vm0, %v61_v3  ;;  %332 = vmatprep.subr.bf16.mxu1 %v1234_v7  ;;  %v1239_v11 = vld [vmem:[#allocation5 + $0x118] ss:$28 sps:$4 sm:$0xff]   ;;  %v1242_v13 = vld [vmem:[#allocation5 + $0xe0] ss:$28 sps:$4 sm:$0xff]   ;;  %v1243_v14 = vld [vmem:[#allocation5 + $0xac] ss:$28 sps:$4 sm:$0xff]  }
  0x1f   :  { %88 = vmatpush1.bf16.msra.mxu0 %v68_v4  ;;  %v1245_v15 = vld [vmem:[#allocation5 + $0xa8] ss:$28 sps:$4 sm:$0xff]   ;;  %v1246_v16 = vld [vmem:[#allocation5 + $0x74] ss:$28 sps:$4 sm:$0xff]   ;;  %v1249_v18 = vld [vmem:[#allocation5 + $0x3c] ss:$28 sps:$4 sm:$0xff]  }
  0x20   :  { %v1248_v17 = vld [vmem:[#allocation5 + $0x70] ss:$28 sps:$4 sm:$0xff]   ;;  %v1251_v19 = vld [vmem:[#allocation5 + $0x38] ss:$28 sps:$4 sm:$0xff]   ;;  %v1252_v20 = vld [vmem:[#allocation5 + $0x4] ss:$28 sps:$4 sm:$0xff]  }
  0x21   :  { %333 = vmatpush1.bf16.msra.mxu1 %v1236_v9  ;;  %v1254_v21 = vld [vmem:[#allocation5] ss:$28 sps:$4 sm:$0xff]   ;;  %v1255_v22 = vld [vmem:[#allocation5 + $0x34c] ss:$28 sps:$4 sm:$0xff]   ;;  %v1258_v24 = vld [vmem:[#allocation5 + $0x314] ss:$28 sps:$4 sm:$0xff]  }
  0x22   :  { %1090 = vmatmul.mubr.msk.bf16.vlgmr.msra.gmra.mxu0 %vm62_vm1, %v51_v8  ;;  %334 = vmatprep.subr.bf16.mxu1 %v1237_v10  ;;  %v1257_v23 = vld [vmem:[#allocation5 + $0x348] ss:$28 sps:$4 sm:$0xff]   ;;  %v1260_v25 = vld [vmem:[#allocation5 + $0x310] ss:$28 sps:$4 sm:$0xff]   ;;  %v1261_v26 = vld [vmem:[#allocation5 + $0x2dc] ss:$28 sps:$4 sm:$0xff]  }
  0x23   :  { %v1263_v27 = vld [vmem:[#allocation5 + $0x2d8] ss:$28 sps:$4 sm:$0xff]   ;;  %v1264_v28 = vld [vmem:[#allocation5 + $0x2a4] ss:$28 sps:$4 sm:$0xff]   ;;  %v1267_v30 = vld [vmem:[#allocation5 + $0x26c] ss:$28 sps:$4 sm:$0xff]  }
  0x24   :  { %v1266_v29 = vld [vmem:[#allocation5 + $0x2a0] ss:$28 sps:$4 sm:$0xff]   ;;  %v1269_v31 = vld [vmem:[#allocation5 + $0x268] ss:$28 sps:$4 sm:$0xff]   ;;  %v1270_v32 = vld [vmem:[#allocation5 + $0x234] ss:$28 sps:$4 sm:$0xff]  }
  0x25   :  { %335 = vmatpush1.bf16.msra.mxu1 %v1239_v11  ;;  %v1272_v33 = vld [vmem:[#allocation5 + $0x230] ss:$28 sps:$4 sm:$0xff]   ;;  %v1273_v34 = vld [vmem:[#allocation5 + $0x1fc] ss:$28 sps:$4 sm:$0xff]   ;;  %v1276_v36 = vld [vmem:[#allocation5 + $0x1c4] ss:$28 sps:$4 sm:$0xff]  }
  0x26   :  { %336 = vmatprep.subr.bf16.mxu1 %v1240_v12  ;;  %v1275_v35 = vld [vmem:[#allocation5 + $0x1f8] ss:$28 sps:$4 sm:$0xff]   ;;  %v1278_v37 = vld [vmem:[#allocation5 + $0x1c0] ss:$28 sps:$4 sm:$0xff]   ;;  %v1279_v38 = vld [vmem:[#allocation5 + $0x190] ss:$28 sps:$4 sm:$0xff]  }
  0x27   :  { %v1281_v39 = vld [vmem:[#allocation5 + $0x194] ss:$28 sps:$4 sm:$0xff]   ;;  %v1284_v40 = vld [vmem:[#allocation5 + $0x15c] ss:$28 sps:$4 sm:$0xff]   ;;  %v1287_v42 = vld [vmem:[#allocation5 + $0x124] ss:$28 sps:$4 sm:$0xff]  }
  0x28   :  { %587 = vmatprep.subr.bf16.mxu0 %v1281_v39  ;;  %v1282_v41 = vld [vmem:[#allocation5 + $0x158] ss:$28 sps:$4 sm:$0xff]   ;;  %v1285_v43 = vld [vmem:[#allocation5 + $0x120] ss:$28 sps:$4 sm:$0xff]   ;;  %v1290_v44 = vld [vmem:[#allocation5 + $0xec] ss:$28 sps:$4 sm:$0xff]  }
  0x29   :  { %337 = vmatpush1.bf16.msra.mxu1 %v1242_v13  ;;  %588 = vmatpush1.bf16.msra.mxu0 %v1279_v38  ;;  %v1288_v45 = vld [vmem:[#allocation5 + $0xe8] ss:$28 sps:$4 sm:$0xff]   ;;  %v1293_v46 = vld [vmem:[#allocation5 + $0xb4] ss:$28 sps:$4 sm:$0xff]   ;;  %v1296_v48 = vld [vmem:[#allocation5 + $0x7c] ss:$28 sps:$4 sm:$0xff]  }
  0x2a   :  { %338 = vmatprep.subr.bf16.mxu1 %v1243_v14  ;;  %589 = vmatprep.subr.bf16.mxu0 %v1284_v40  ;;  %v1291_v47 = vld [vmem:[#allocation5 + $0xb0] ss:$28 sps:$4 sm:$0xff]   ;;  %v1294_v49 = vld [vmem:[#allocation5 + $0x78] ss:$28 sps:$4 sm:$0xff]   ;;  %v1299_v50 = vld [vmem:[#allocation5 + $0x44] ss:$28 sps:$4 sm:$0xff]  }
  0x2b   :  { %v1297_v51 = vld [vmem:[#allocation5 + $0x40] ss:$28 sps:$4 sm:$0xff]   ;;  %v1302_v52 = vld [vmem:[#allocation5 + $0xc] ss:$28 sps:$4 sm:$0xff]   ;;  %v1305_v54 = vld [vmem:[#allocation5 + $0x354] ss:$28 sps:$4 sm:$0xff]  }
  0x2c   :  { %v1300_v53 = vld [vmem:[#allocation5 + $0x8] ss:$28 sps:$4 sm:$0xff]   ;;  %v1303_v55 = vld [vmem:[#allocation5 + $0x350] ss:$28 sps:$4 sm:$0xff]   ;;  %v1308_v56 = vld [vmem:[#allocation5 + $0x31c] ss:$28 sps:$4 sm:$0xff]  }
  0x2d   :  { %339 = vmatpush1.bf16.msra.mxu1 %v1245_v15  ;;  %590 = vmatpush1.bf16.msra.mxu0 %v1282_v41  ;;  %v1306_v57 = vld [vmem:[#allocation5 + $0x318] ss:$28 sps:$4 sm:$0xff]   ;;  %v1311_v58 = vld [vmem:[#allocation5 + $0x2e4] ss:$28 sps:$4 sm:$0xff]   ;;  %v1314_v60 = vld [vmem:[#allocation5 + $0x2ac] ss:$28 sps:$4 sm:$0xff]  }
  0x2e   :  { %340 = vmatprep.subr.bf16.mxu1 %v1246_v16  ;;  %591 = vmatprep.subr.bf16.mxu0 %v1287_v42  ;;  %v1309_v59 = vld [vmem:[#allocation5 + $0x2e0] ss:$28 sps:$4 sm:$0xff]   ;;  %v1312_v61 = vld [vmem:[#allocation5 + $0x2a8] ss:$28 sps:$4 sm:$0xff]   ;;  %v1317_v62 = vld [vmem:[#allocation5 + $0x274] ss:$28 sps:$4 sm:$0xff]  }
  0x2f   :  { %v1315_v63 = vld [vmem:[#allocation5 + $0x270] ss:$28 sps:$4 sm:$0xff]   ;;  %v1320_v0 = vld [vmem:[#allocation5 + $0x23c] ss:$28 sps:$4 sm:$0xff]   ;;  %v47_v4 = vld [vmem:[%s1547_s3 + $0x8] sm:$0xff]  ;;  %v1505_v6 = vshrl.u32 %v119_v2, 7 }
  0x30   :  { %v1318_v1 = vld [vmem:[#allocation5 + $0x238] ss:$28 sps:$4 sm:$0xff]   ;;  %v46_v3 = vld [vmem:[%s1547_s3] sm:$0xff]  ;;  %v1507_v7 = vpack.c.bf16 %v47_v4, %v47_v4  ;;  %v1347_v41 = vld [vmem:[#allocation5 + $0x4c] ss:$28 sps:$4 sm:$0xff]   ;;  %s1462_s3 = smov [#allocation7]  }
  0x31   :  { %341 = vmatpush1.bf16.msra.mxu1 %v1248_v17  ;;  %592 = vmatpush1.bf16.msra.mxu0 %v1285_v43  ;;  %v1503_v5 = vpack.c.bf16 %v46_v3, %v46_v3  ;;  %v1514_v9 = vsub.s32 0, %v1505_v6  ;;  %v1339_v38 = vld [vmem:[#allocation5 + $0xb8] ss:$28 sps:$4 sm:$0xff]   ;;  %v1344_v39 = vld [vmem:[#allocation5 + $0x84] ss:$28 sps:$4 sm:$0xff]   ;;  %s1078_s30 = sshll.u32 %s1462_s3, 4  ;;  %s1079_s30 = int_to_ptr.vmem [resolvable:$true] %s1078_s30 }
  0x32   :  { %342 = vmatprep.subr.bf16.mxu1 %v1249_v18  ;;  %593 = vmatprep.subr.bf16.mxu0 %v1290_v44  ;;  %v1518_v10 = vpack.i.b16 %v1507_v7, %v1507_v7  ;;  %v1342_v40 = vld [vmem:[#allocation5 + $0x80] ss:$28 sps:$4 sm:$0xff]   ;;  %v1345_v42 = vld [vmem:[#allocation5 + $0x48] ss:$28 sps:$4 sm:$0xff]   ;;  %v1350_v43 = vld [vmem:[#allocation5 + $0x14] ss:$28 sps:$4 sm:$0xff]   ;;  %p1436_p11 = scmp.lt.s32.totalorder %s1079_s30, %s1079_s30 }
  0x33   :  { %v1511_v8 = vpack.i.b16 %v1503_v5, %v1503_v5  ;;  %v1348_v44 = vld [vmem:[#allocation5 + $0x10] ss:$28 sps:$4 sm:$0xff]   ;;  %s1431_s5 = scalar_lea.vmem %s1079_s30, 64 }
  0x34   :  { %v129_v14 = vrot.slane %v1518_v10, %v1514_v9  ;;  %p1432_p10 = scmp.ne.s32.totalorder %s1079_s30, %s1431_s5  ;;  %p1437_p12 = scmp.lt.s32.totalorder %s1431_s5, %s1431_s5 }
  0x35   :  { %343 = vmatpush1.bf16.msra.mxu1 %v1251_v19  ;;  %594 = vmatpush1.bf16.msra.mxu0 %v1288_v45  ;;  %v122_v11 = vrot.slane %v1511_v8, %v1514_v9  ;;  %v1353_v45 = vld [vmem:[#allocation5 + $0x35c] ss:$28 sps:$4 sm:$0xff]  }
  0x36   :  { %344 = vmatprep.subr.bf16.mxu1 %v1252_v20  ;;  %595 = vmatprep.subr.bf16.mxu0 %v1293_v46  ;;  %v1351_v46 = vld [vmem:[#allocation5 + $0x358] ss:$28 sps:$4 sm:$0xff]   ;;  %p1438_p13 = por %p1437_p12, %p1436_p11 }
  0x38   :  { %p1439_p0 = pnand %p1438_p13, %p1432_p10 }
  0x39   :  { %345 = vmatpush1.bf16.msra.mxu1 %v1254_v21  ;;  %596 = vmatpush1.bf16.msra.mxu0 %v1291_v47  ;;  %v1356_v47 = vld [vmem:[#allocation5 + $0x324] ss:$28 sps:$4 sm:$0xff]  }
  0x3a   :  { %346 = vmatprep.subr.bf16.mxu1 %v1255_v22  ;;  %597 = vmatprep.subr.bf16.mxu0 %v1296_v48  ;;  %v1354_v48 = vld [vmem:[#allocation5 + $0x320] ss:$28 sps:$4 sm:$0xff]  }
  0x3d   :  { %347 = vmatpush2.bf16.msra.mxu1 %v1257_v23  ;;  %598 = vmatpush1.bf16.msra.mxu0 %v1294_v49  ;;  %v1359_v49 = vld [vmem:[#allocation5 + $0x2ec] ss:$28 sps:$4 sm:$0xff]  }
  0x3e   :  { %348 = vmatprep.subr.bf16.mxu1 %v1258_v24  ;;  %599 = vmatprep.subr.bf16.mxu0 %v1299_v50  ;;  %v1357_v50 = vld [vmem:[#allocation5 + $0x2e8] ss:$28 sps:$4 sm:$0xff]  }
  0x41   :  { %349 = vmatpush2.bf16.msra.mxu1 %v1260_v25  ;;  %600 = vmatpush1.bf16.msra.mxu0 %v1297_v51  ;;  %v1323_v25 = vld [vmem:[#allocation5 + $0x204] ss:$28 sps:$4 sm:$0xff]   ;;  %v1362_v51 = vld [vmem:[#allocation5 + $0x2b4] ss:$28 sps:$4 sm:$0xff]  }
  0x42   :  { %350 = vmatprep.subr.bf16.mxu1 %v1261_v26  ;;  %601 = vmatprep.subr.bf16.mxu0 %v1302_v52  ;;  %v1321_v26 = vld [vmem:[#allocation5 + $0x200] ss:$28 sps:$4 sm:$0xff]   ;;  %v1360_v52 = vld [vmem:[#allocation5 + $0x2b0] ss:$28 sps:$4 sm:$0xff]  }
  0x45   :  { %351 = vmatpush2.bf16.msra.mxu1 %v1263_v27  ;;  %602 = vmatpush1.bf16.msra.mxu0 %v1300_v53  ;;  %v1326_v27 = vld [vmem:[#allocation5 + $0x1cc] ss:$28 sps:$4 sm:$0xff]   ;;  %v1365_v53 = vld [vmem:[#allocation5 + $0x27c] ss:$28 sps:$4 sm:$0xff]  }
  0x46   :  { %352 = vmatprep.subr.bf16.mxu1 %v1264_v28  ;;  %603 = vmatprep.subr.bf16.mxu0 %v1305_v54  ;;  %v1324_v28 = vld [vmem:[#allocation5 + $0x1c8] ss:$28 sps:$4 sm:$0xff]   ;;  %v1363_v54 = vld [vmem:[#allocation5 + $0x278] ss:$28 sps:$4 sm:$0xff]  }
  0x49   :  { %353 = vmatpush2.bf16.msra.mxu1 %v1266_v29  ;;  %604 = vmatpush2.bf16.msra.mxu0 %v1303_v55  ;;  %v1327_v29 = vld [vmem:[#allocation5 + $0x198] ss:$28 sps:$4 sm:$0xff]   ;;  %v1368_v55 = vld [vmem:[#allocation5 + $0x244] ss:$28 sps:$4 sm:$0xff]  }
  0x4a   :  { %354 = vmatprep.subr.bf16.mxu1 %v1267_v30  ;;  %605 = vmatprep.subr.bf16.mxu0 %v1308_v56  ;;  %v1329_v30 = vld [vmem:[#allocation5 + $0x19c] ss:$28 sps:$4 sm:$0xff]  }
  0x4b   :  { %v1366_v56 = vld [vmem:[#allocation5 + $0x240] ss:$28 sps:$4 sm:$0xff]  }
  0x4d   :  { %355 = vmatpush2.bf16.msra.mxu1 %v1269_v31  ;;  %606 = vmatpush2.bf16.msra.mxu0 %v1306_v57  ;;  %v1332_v31 = vld [vmem:[#allocation5 + $0x164] ss:$28 sps:$4 sm:$0xff]   ;;  %v373_v57 = vshrl.u32 %v1503_v5, 16 }
  0x4e   :  { %356 = vmatprep.subr.bf16.mxu1 %v1270_v32  ;;  %607 = vmatprep.subr.bf16.mxu0 %v1311_v58  ;;  %v1330_v32 = vld [vmem:[#allocation5 + $0x160] ss:$28 sps:$4 sm:$0xff]   ;;  %v380_v58 = vshrl.u32 %v1507_v7, 16 }
  0x51   :  { %357 = vmatpush2.bf16.msra.mxu1 %v1272_v33  ;;  %608 = vmatpush2.bf16.msra.mxu0 %v1309_v59  ;;  %v1335_v33 = vld [vmem:[#allocation5 + $0x12c] ss:$28 sps:$4 sm:$0xff]   ;;  %v1526_v59 = vpack.i.b16 %v373_v57, %v373_v57 }
  0x52   :  { %358 = vmatprep.subr.bf16.mxu1 %v1273_v34  ;;  %609 = vmatprep.subr.bf16.mxu0 %v1314_v60  ;;  %v1333_v34 = vld [vmem:[#allocation5 + $0x128] ss:$28 sps:$4 sm:$0xff]   ;;  %v1528_v60 = vpack.i.b16 %v380_v58, %v380_v58 }
  0x55   :  { %359 = vmatpush2.bf16.msra.mxu1 %v1275_v35  ;;  %610 = vmatpush2.bf16.msra.mxu0 %v1312_v61  ;;  %v1338_v35 = vld [vmem:[#allocation5 + $0xf4] ss:$28 sps:$4 sm:$0xff]   ;;  %v379_v61 = vrot.slane %v1526_v59, %v1514_v9 }
  0x56   :  { %360 = vmatprep.subr.bf16.mxu1 %v1276_v36  ;;  %611 = vmatprep.subr.bf16.mxu0 %v1317_v62  ;;  %v1336_v36 = vld [vmem:[#allocation5 + $0xf0] ss:$28 sps:$4 sm:$0xff]  }
  0x59   :  { %361 = vmatpush2.bf16.msra.mxu1 %v1278_v37  ;;  %612 = vmatpush2.bf16.msra.mxu0 %v1315_v63  ;;  %v1341_v37 = vld [vmem:[#allocation5 + $0xbc] ss:$28 sps:$4 sm:$0xff]  }
  0x5a   :  { %613 = vmatprep.subr.bf16.mxu0 %v1320_v0  ;;  %838 = vmatprep.subr.bf16.mxu1 %v1329_v30  ;;  %v386_v0 = vrot.slane %v1528_v60, %v1514_v9  ;;  %v1372_v9 = vld [vmem:[#allocation5 + $0x1d0] ss:$28 sps:$4 sm:$0xff]   ;;  %v632_v30 = vsub.s32 1, %v1505_v6 }
  0x5d   :  { %614 = vmatpush2.bf16.msra.mxu0 %v1318_v1 }
  0x5e   :  { %615 = vmatprep.subr.bf16.mxu0 %v1323_v25  ;;  %v1381_v25 = vld [vmem:[#allocation5 + $0x2b8] ss:$28 sps:$4 sm:$0xff]  }
  0x61   :  { %616 = vmatpush2.bf16.msra.mxu0 %v1321_v26  ;;  %v1382_v26 = vld [vmem:[#allocation5 + $0xf8] ss:$28 sps:$4 sm:$0xff]  }
  0x62   :  { %617 = vmatprep.subr.bf16.mxu0 %v1326_v27  ;;  %v1383_v27 = vld [vmem:[#allocation5 + $0x280] ss:$28 sps:$4 sm:$0xff]  }
  0x65   :  { %618 = vmatpush2.bf16.msra.mxu0 %v1324_v28  ;;  %v1384_v28 = vld [vmem:[#allocation5 + $0xc0] ss:$28 sps:$4 sm:$0xff]  }
  0xe2   :  { %v107_v12 = vpop.f32.mrf.mxu0 }
  0xe3   :  { %v114_v13 = vpack.c.bf16 %v107_v12, %v107_v12 }
  0xe4   :  { %v109_v15 = vpop.f32.mrf.mxu0 }
  0xe5   :  { %v130_v16 = vadd.bf16 %v122_v11, %v114_v13  ;;  %v115_v17 = vpack.c.bf16 %v109_v15, %v109_v15 }
  0xe6   :  { %v111_v18 = vpop.f32.mrf.mxu0 }
  0xe7   :  { %v131_v19 = vadd.bf16 %v129_v14, %v115_v17  ;;  %v134_v21 = vmul.bf16 1009007652, %v130_v16  ;;  %vm132_vm3 = vcmp.gt.bf16.partialorder %v130_v16, 0  ;;  %v1369_v17 = vld [vmem:[#allocation5 + $0x208] ss:$28 sps:$4 sm:$0xff]  }
  0xe8   :  { %v112_v20 = vpop.f32.mrf.mxu0  ;;  %v1374_v18 = vld [vmem:[#allocation5 + $0x1d4] ss:$28 sps:$4 sm:$0xff]  }
  0xe9   :  { %vm133_vm2 = vcmp.gt.bf16.partialorder %v131_v19, 0  ;;  %v135_v22 = vmul.bf16 1009007652, %v131_v19  ;;  %v136_v24 = vsel %vm132_vm3, %v130_v16, %v134_v21  ;;  %v1371_v16 = vld [vmem:[#allocation5 + $0x20c] ss:$28 sps:$4 sm:$0xff]  }
  0xea   :  { %v1376_v20 = vld [vmem:[#allocation5 + $0x1a0] ss:$28 sps:$4 sm:$0xff]   ;;  %v1377_v21 = vld [vmem:[#allocation5 + $0x328] ss:$28 sps:$4 sm:$0xff]  }
  0xeb   :  { %v137_v23 = vsel %vm133_vm2, %v131_v19, %v135_v22  ;;  %v1375_v19 = vld [vmem:[#allocation5 + $0x360] ss:$28 sps:$4 sm:$0xff]   ;;  %v1378_v22 = vld [vmem:[#allocation5 + $0x168] ss:$28 sps:$4 sm:$0xff]  }
  0xec   :  { %362 = vmatprep.mubr.bf16.mxu1 %v137_v23  ;;  %1203 = vmatprep.subr.bf16.mxu0 %v1375_v19  ;;  %v1379_v23 = vld [vmem:[#allocation5 + $0x2f0] ss:$28 sps:$4 sm:$0xff]  }
  0xed   :  { %363 = vmatmul.mubr.bf16.vlgmr.msra.gmra.mxu1 %v136_v24  ;;  %v1380_v24 = vld [vmem:[#allocation5 + $0x130] ss:$28 sps:$4 sm:$0xff]  }
  0xee   :  { %839 = vmatpush1.bf16.msra.mxu1 %v1327_v29  ;;  %v1385_v29 = vld [vmem:[#allocation5 + $0x248] ss:$28 sps:$4 sm:$0xff]  }
  0xef   :  { %840 = vmatprep.subr.bf16.mxu1 %v1332_v31  ;;  %v633_v31 = vrot.slane %v1511_v8, %v632_v30  ;;  %v1387_v8 = vld [vmem:[#allocation5 + $0x210] ss:$28 sps:$4 sm:$0xff]  }
  0xf2   :  { %841 = vmatpush1.bf16.msra.mxu1 %v1330_v32 }
  0xf3   :  { %842 = vmatprep.subr.bf16.mxu1 %v1335_v33 }
  0xf6   :  { %843 = vmatpush1.bf16.msra.mxu1 %v1333_v34  ;;  %v637_v34 = vrot.slane %v1518_v10, %v632_v30  ;;  %v1389_v10 = vld [vmem:[#allocation5 + $0x1d8] ss:$28 sps:$4 sm:$0xff]  }
  0xf7   :  { %844 = vmatprep.subr.bf16.mxu1 %v1338_v35 }
  0xfa   :  { %845 = vmatpush1.bf16.msra.mxu1 %v1336_v36 }
  0xfb   :  { %846 = vmatprep.subr.bf16.mxu1 %v1341_v37 }
  0xfe   :  { %847 = vmatpush1.bf16.msra.mxu1 %v1339_v38 }
  0xff   :  { %848 = vmatprep.subr.bf16.mxu1 %v1344_v39 }
 0x102   :  { %849 = vmatpush1.bf16.msra.mxu1 %v1342_v40 }
 0x103   :  { %850 = vmatprep.subr.bf16.mxu1 %v1347_v41 }
 0x106   :  { %851 = vmatpush1.bf16.msra.mxu1 %v1345_v42 }
 0x107   :  { %852 = vmatprep.subr.bf16.mxu1 %v1350_v43 }
 0x10a   :  { %853 = vmatpush1.bf16.msra.mxu1 %v1348_v44 }
 0x10b   :  { %854 = vmatprep.subr.bf16.mxu1 %v1353_v45  ;;  %v1386_v45 = vld [vmem:[#allocation5 + $0x88] ss:$28 sps:$4 sm:$0xff]  }
 0x10e   :  { %855 = vmatpush2.bf16.msra.mxu1 %v1351_v46  ;;  %v1388_v46 = vld [vmem:[#allocation5 + $0x50] ss:$28 sps:$4 sm:$0xff]  }
 0x10f   :  { %856 = vmatprep.subr.bf16.mxu1 %v1356_v47  ;;  %v1390_v47 = vld [vmem:[#allocation5 + $0x18] ss:$28 sps:$4 sm:$0xff]  }
 0x112   :  { %857 = vmatpush2.bf16.msra.mxu1 %v1354_v48  ;;  %v884_v48 = vrot.slane %v1526_v59, %v632_v30  ;;  %v929_v59 = vunpack.c.l.bf16 %v1503_v5 }
 0x113   :  { %858 = vmatprep.subr.bf16.mxu1 %v1359_v49 }
 0x116   :  { %859 = vmatpush2.bf16.msra.mxu1 %v1357_v50 }
 0x117   :  { %860 = vmatprep.subr.bf16.mxu1 %v1362_v51  ;;  %v888_v51 = vrot.slane %v1528_v60, %v632_v30 }
 0x11a   :  { %861 = vmatpush2.bf16.msra.mxu1 %v1360_v52 }
 0x11b   :  { %862 = vmatprep.subr.bf16.mxu1 %v1365_v53 }
 0x11e   :  { %863 = vmatpush2.bf16.msra.mxu1 %v1363_v54 }
 0x11f   :  { %864 = vmatprep.subr.bf16.mxu1 %v1368_v55 }
 0x122   :  { %865 = vmatpush2.bf16.msra.mxu1 %v1366_v56 }
 0x123   :  { %866 = vmatprep.subr.bf16.mxu1 %v1371_v16 }
 0x126   :  { %867 = vmatpush2.bf16.msra.mxu1 %v1369_v17 }
 0x127   :  { %868 = vmatprep.subr.bf16.mxu1 %v1374_v18 }
 0x12a   :  { %869 = vmatpush2.bf16.msra.mxu1 %v1372_v9 }
 0x1ad   :  { %v364_v62 = vpop.f32.mrf.mxu1 }
 0x1ae   :  { %v371_v63 = vpack.c.bf16 %v364_v62, %v364_v62 }
 0x1af   :  { %v366_v1 = vpop.f32.mrf.mxu1 }
 0x1b0   :  { %v387_v2 = vadd.bf16 %v379_v61, %v371_v63  ;;  %v372_v3 = vpack.c.bf16 %v366_v1, %v366_v1 }
 0x1b1   :  { %v368_v4 = vpop.f32.mrf.mxu1 }
 0x1b2   :  { %v388_v11 = vadd.bf16 %v386_v0, %v372_v3  ;;  %v391_v12 = vmul.bf16 1009007652, %v387_v2  ;;  %vm389_vm5 = vcmp.gt.bf16.partialorder %v387_v2, 0  ;;  %v932_v0 = vsub.s32 4, %v1505_v6 }
 0x1b3   :  { %v369_v13 = vpop.f32.mrf.mxu1 }
 0x1b4   :  { %vm390_vm4 = vcmp.gt.bf16.partialorder %v388_v11, 0  ;;  %v392_v7 = vmul.bf16 1009007652, %v388_v11  ;;  %v393_v15 = vsel %vm389_vm5, %v387_v2, %v391_v12  ;;  %v933_v60 = vrot.slane %v929_v59, %v932_v0 }
 0x1b6   :  { %v394_v14 = vsel %vm390_vm4, %v388_v11, %v392_v7 }
 0x1b7   :  { %619 = vmatprep.mubr.bf16.mxu0 %v394_v14 }
 0x1b8   :  { %620 = vmatmul.mubr.bf16.vlgmr.msra.gmra.mxu0 %v393_v15 }
 0x1b9   :  { %1204 = vmatpush3.bf16.msra.mxu0 %v1376_v20 }
 0x1ba   :  { %1205 = vmatprep.subr.bf16.mxu0 %v1377_v21 }
 0x1bd   :  { %1206 = vmatpush3.bf16.msra.mxu0 %v1378_v22 }
 0x1be   :  { %1207 = vmatprep.subr.bf16.mxu0 %v1379_v23 }
 0x1c1   :  { %1208 = vmatpush3.bf16.msra.mxu0 %v1380_v24 }
 0x1c2   :  { %1209 = vmatprep.subr.bf16.mxu0 %v1381_v25 }
 0x1c5   :  { %1210 = vmatpush3.bf16.msra.mxu0 %v1382_v26 }
 0x1c6   :  { %1211 = vmatprep.subr.bf16.mxu0 %v1383_v27 }
 0x1c9   :  { %1212 = vmatpush3.bf16.msra.mxu0 %v1384_v28 }
 0x1ca   :  { %1213 = vmatprep.subr.bf16.mxu0 %v1385_v29 }
 0x1cd   :  { %1214 = vmatpush3.bf16.msra.mxu0 %v1386_v45 }
 0x1ce   :  { %1215 = vmatprep.subr.bf16.mxu0 %v1387_v8 }
 0x1d1   :  { %1216 = vmatpush3.bf16.msra.mxu0 %v1388_v46 }
 0x1d2   :  { %1217 = vmatprep.subr.bf16.mxu0 %v1389_v10 }
 0x1d5   :  { %1218 = vmatpush3.bf16.msra.mxu0 %v1390_v47 }
 0x278   :  { %v621_v32 = vpop.f32.mrf.mxu0 }
 0x279   :  { %v628_v33 = vpack.c.bf16 %v621_v32, %v621_v32 }
 0x27a   :  { %v623_v35 = vpop.f32.mrf.mxu0 }
 0x27b   :  { %v638_v36 = vadd.bf16 %v633_v31, %v628_v33  ;;  %v629_v37 = vpack.c.bf16 %v623_v35, %v623_v35 }
 0x27c   :  { %v625_v38 = vpop.f32.mrf.mxu0 }
 0x27d   :  { %v639_v39 = vadd.bf16 %v637_v34, %v629_v37  ;;  %v642_v40 = vmul.bf16 1009007652, %v638_v36  ;;  %vm640_vm7 = vcmp.gt.bf16.partialorder %v638_v36, 0 }
 0x27e   :  { %v626_v41 = vpop.f32.mrf.mxu0 }
 0x27f   :  { %vm641_vm6 = vcmp.gt.bf16.partialorder %v639_v39, 0  ;;  %v643_v42 = vmul.bf16 1009007652, %v639_v39  ;;  %v644_v44 = vsel %vm640_vm7, %v638_v36, %v642_v40 }
 0x281   :  { %v645_v43 = vsel %vm641_vm6, %v639_v39, %v643_v42 }
 0x282   :  { %870 = vmatprep.mubr.bf16.mxu1 %v645_v43 }
 0x283   :  { %871 = vmatmul.mubr.bf16.vlgmr.msra.gmra.mxu1 %v644_v44 }
 0x343   :  { %v872_v49 = vpop.f32.mrf.mxu1 }
 0x344   :  { %v879_v50 = vpack.c.bf16 %v872_v49, %v872_v49 }
 0x345   :  { %v874_v52 = vpop.f32.mrf.mxu1 }
 0x346   :  { %v889_v53 = vadd.bf16 %v884_v48, %v879_v50  ;;  %v880_v54 = vpack.c.bf16 %v874_v52, %v874_v52 }
 0x347   :  { %v876_v55 = vpop.f32.mrf.mxu1 }
 0x348   :  { %v890_v56 = vadd.bf16 %v888_v51, %v880_v54  ;;  %v893_v57 = vmul.bf16 1009007652, %v889_v53  ;;  %vm891_vm9 = vcmp.gt.bf16.partialorder %v889_v53, 0 }
 0x349   :  { %v877_v58 = vpop.f32.mrf.mxu1 }
 0x34a   :  { %vm892_vm8 = vcmp.gt.bf16.partialorder %v890_v56, 0  ;;  %v894_v61 = vmul.bf16 1009007652, %v890_v56  ;;  %v895_v63 = vsel %vm891_vm9, %v889_v53, %v893_v57 }
 0x34c   :  { %v896_v62 = vsel %vm892_vm8, %v890_v56, %v894_v61 }
 0x34d   :  { %1062 = vmatprep.mubr.bf16.mxu0 %v896_v62 }
 0x34e   :  { %1063 = vmatmul.mubr.bf16.vlgmr.msra.gmra.mxu0 %v895_v63 }
 0x40e   :  { %v1219_v1 = vpop.f32.mrf.mxu0 }
 0x410   :  { %v1220_v2 = vpop.f32.mrf.mxu0 }
 0x411   :  { %v1221_v3 = vadd.f32 %v1220_v2, %v1219_v1 }
 0x412   :  { %v1222_v4 = vpop.f32.mrf.mxu0 }
 0x413   :  { %v1065_v11 = vadd.f32 %v1221_v3, %v933_v60 }
 0x414   :  { %v1223_v12 = vpop.f32.mrf.mxu0 }
 0x415   :  { %v1070_v13 = vpack.c.bf16 %v1065_v11, %v1065_v11 }
 0x417   :  { %1071 = vst [vmem:[#allocation7] sm:$0xf] %v1070_v13 }
 0x418   :  { %1442 = shalt.err (!%p1439_p0)
}
 0x419   :  { %1081 = dma.vmem_to_hbm [thread:$0]  %s1079_s30, 64, %s1548_s4, [#allocation4]  }
 0x41a   :  { %1455 = dma.done.wait [#allocation4], 64  }
 0x41b   :  { %1456 = vsyncadd [#allocation4], 4294967232 }
 0x41c   :  { %1085 = vsyncpa [#allocation3], 1 }
 0x41d   :  { %1086 = vsyncpa [#allocation6], 1 }
 0x41e   :  { %1087 = vsyncpa [#allocation4], 1 }

</bundles_post_ra>
